<compile_context>
chip_gen: v7x
topology: tpu7x:2x2x1
jax: 0.10.0
libtpu: 0.0.40
codegen_flags: <defaults>
</compile_context>

<pallas_src>
import functools

import jax
import jax.numpy as jnp
from jax import lax
from jax.experimental import pallas as pl
from jax.experimental.pallas import tpu as pltpu

_SQRT2 = 1.4142135623730951


def _gelu_exact(x):
    # nn.GELU() default is the exact erf form; keep it (and keep it in f32 —
    # v5e has no bf16 VPU/EUP path).
    return 0.5 * x * (1.0 + lax.erf(x / _SQRT2))


def _round_up(a, b):
    return -(-a // b) * b


def mlp_kernel(x_ref, w1_ref, b1_ref, w2_ref, b2_ref, o_ref):
    # fc1: (tm, Cin) @ (Cin, H) on the MXU, bf16 inputs, f32 accumulation.
    x_bf16 = x_ref[...].astype(jnp.bfloat16)
    h = jnp.dot(x_bf16, w1_ref[...], preferred_element_type=jnp.float32)
    h = h + b1_ref[...]                    # bias + GELU in f32
    h = _gelu_exact(h)
    # fc2: (tm, H) @ (H, Cout); hidden activations rounded to bf16 for the MXU.
    o = jnp.dot(h.astype(jnp.bfloat16), w2_ref[...],
                preferred_element_type=jnp.float32)
    o = o + b2_ref[...]
    o_ref[...] = o.astype(o_ref.dtype)
    # NOTE: if bundle dumps ever show vreg spills for very large tm*H, add a
    # hidden/Cout grid axis instead of shrinking tm.


@functools.partial(jax.jit, static_argnames=("tm", "single_buffer_weights"))
def _mlp_pallas(x2d, w1, b1, w2, b2, *, tm, single_buffer_weights):
    """x2d: (Mp, Cin_p) f32; w1/w2 bf16; b1/b2 f32 row vectors. All lane-dense."""
    Mp, Cin_p = x2d.shape
    H_p = w1.shape[1]
    Cout_p = w2.shape[1]

    # Weights / biases are grid-invariant: single-buffer them so big (ViT-class)
    # weights don't blow the scoped VMEM budget (esp. v7x's 64 MiB VMEM).
    wkw = (dict(pipeline_mode=pl.Buffered(buffer_count=1))
           if single_buffer_weights else {})

    flops = 2 * Mp * (Cin_p * H_p + H_p * Cout_p)
    bytes_accessed = (
        Mp * Cin_p * x2d.dtype.itemsize          # x in
        + Mp * Cout_p * x2d.dtype.itemsize       # out
        + Cin_p * H_p * w1.dtype.itemsize        # w1 (bf16)
        + H_p * Cout_p * w2.dtype.itemsize       # w2 (bf16)
        + (H_p + Cout_p) * 4                     # biases
    )

    return pl.pallas_call(
        mlp_kernel,
        out_shape=jax.ShapeDtypeStruct((Mp, Cout_p), x2d.dtype),
        grid_spec=pltpu.PrefetchScalarGridSpec(
            num_scalar_prefetch=0,
            grid=(Mp // tm,),
            in_specs=[
                pl.BlockSpec((tm, Cin_p), lambda i: (i, 0)),
                pl.BlockSpec((Cin_p, H_p), lambda i: (0, 0), **wkw),
                pl.BlockSpec((1, H_p), lambda i: (0, 0), **wkw),
                pl.BlockSpec((H_p, Cout_p), lambda i: (0, 0), **wkw),
                pl.BlockSpec((1, Cout_p), lambda i: (0, 0), **wkw),
            ],
            out_specs=pl.BlockSpec((tm, Cout_p), lambda i: (i, 0)),
        ),
        compiler_params=pltpu.CompilerParams(
            dimension_semantics=("parallel",),     # token axis splits across TCs
            vmem_limit_bytes=64 * 1024 * 1024,
        ),
        cost_estimate=pl.CostEstimate(
            flops=flops,
            transcendentals=Mp * H_p,              # erf per hidden activation
            bytes_accessed=bytes_accessed,
        ),
    )(x2d, w1, b1, w2, b2)


def mlp_forward(x, w1, b1, w2, b2, *, tm=256):
    """x: (B, N, Cin); w1: (Cin, H); b1: (H,); w2: (H, Cout); b2: (Cout,)."""
    B, N, Cin = x.shape
    H = w1.shape[1]
    Cout = w2.shape[1]
    M = B * N

    # Lane-dense feature dims (multiples of 128) and row-tile padding so that
    # arbitrary token counts (e.g. ViT N=197) work with a large tm.
    Cin_p = _round_up(Cin, 128)
    H_p = _round_up(H, 128)
    Cout_p = _round_up(Cout, 128)
    tm_eff = min(tm, _round_up(M, 8))          # keep sublane-aligned row tile
    Mp = _round_up(M, tm_eff)

    x2d = jnp.pad(x.reshape(M, Cin).astype(jnp.float32),
                  ((0, Mp - M), (0, Cin_p - Cin)))
    # Ship weights as bf16 (halves VMEM/HBM footprint; MXU-native). Biases f32.
    w1p = jnp.pad(w1, ((0, Cin_p - Cin), (0, H_p - H))).astype(jnp.bfloat16)
    b1p = jnp.pad(b1, (0, H_p - H)).reshape(1, H_p).astype(jnp.float32)
    w2p = jnp.pad(w2, ((0, H_p - H), (0, Cout_p - Cout))).astype(jnp.bfloat16)
    b2p = jnp.pad(b2, (0, Cout_p - Cout)).reshape(1, Cout_p).astype(jnp.float32)

    try:
        out2d = _mlp_pallas(x2d, w1p, b1p, w2p, b2p,
                            tm=tm_eff, single_buffer_weights=True)
        out2d.block_until_ready()
    except Exception:
        # pipeline_mode / Buffered(1) not supported by this jax version:
        # fall back to default double-buffered weight BlockSpecs.
        out2d = _mlp_pallas(x2d, w1p, b1p, w2p, b2p,
                            tm=tm_eff, single_buffer_weights=False)

    return out2d[:M, :Cout].reshape(B, N, Cout).astype(x.dtype)


def init_mlp_params(key, in_features, hidden_features, out_features,
                    dtype=jnp.float32):
    # Deterministic synthetic init (uniform, roughly torch.nn.Linear-like bounds).
    k1, k2, k3, k4 = jax.random.split(key, 4)
    lim1 = 1.0 / (in_features ** 0.5)
    lim2 = 1.0 / (hidden_features ** 0.5)
    w1 = jax.random.uniform(k1, (in_features, hidden_features),
                            minval=-lim1, maxval=lim1, dtype=dtype)
    b1 = jax.random.uniform(k2, (hidden_features,),
                            minval=-lim1, maxval=lim1, dtype=dtype)
    w2 = jax.random.uniform(k3, (hidden_features, out_features),
                            minval=-lim2, maxval=lim2, dtype=dtype)
    b2 = jax.random.uniform(k4, (out_features,),
                            minval=-lim2, maxval=lim2, dtype=dtype)
    return w1, b1, w2, b2


if __name__ == "__main__":
    # Small ViT-MLP-like shapes: batch=2, seq=8, in=32, hidden=64, out=32.
    # (Feature dims are zero-padded to 128 inside the wrapper for lane density.)
    B, N, Cin, H = 2, 8, 32, 64
    key = jax.random.PRNGKey(0)
    kx, kp = jax.random.split(key)
    x = jax.random.normal(kx, (B, N, Cin), dtype=jnp.float32)
    w1, b1, w2, b2 = init_mlp_params(kp, Cin, H, Cin)

    # TODO(synk): dropout with p>0 and the `search=True` alpha scaling are not
    # exercised (default config: drop=0.0, search=False -> identity ops).

    out = mlp_forward(x, w1, b1, w2, b2)
    jax.block_until_ready(out)

    # Tight check vs. a reference that uses the same bf16-operand / f32-accum
    # matmul recipe as the kernel.
    x2 = x.reshape(-1, Cin)
    h_bf = jnp.dot(x2.astype(jnp.bfloat16), w1.astype(jnp.bfloat16),
                   preferred_element_type=jnp.float32) + b1
    h_bf = _gelu_exact(h_bf)
    ref_bf = (jnp.dot(h_bf.astype(jnp.bfloat16), w2.astype(jnp.bfloat16),
                      preferred_element_type=jnp.float32) + b2).reshape(B, N, Cin)
    assert jnp.allclose(out, ref_bf, atol=2e-3, rtol=2e-3), "mismatch vs bf16 ref"

    # Loose check vs. the exact f32 module semantics (bf16 rounding only).
    h32 = _gelu_exact(jnp.dot(x2, w1) + b1)
    ref32 = (jnp.dot(h32, w2) + b2).reshape(B, N, Cin)
    assert jnp.allclose(out, ref32, atol=5e-2, rtol=5e-2), "mismatch vs f32 ref"

    print("KERNEL_OK")
</pallas_src>

<mosaic_0001>
module attributes {stable_mosaic.version = 11 : i64} {
  func.func @mlp_kernel(%arg0: i32, %arg1: memref<16x128xf32, #tpu.memory_space<vmem>>, %arg2: memref<128x128xbf16, #tpu.memory_space<vmem>>, %arg3: memref<1x128xf32, #tpu.memory_space<vmem>>, %arg4: memref<128x128xbf16, #tpu.memory_space<vmem>>, %arg5: memref<1x128xf32, #tpu.memory_space<vmem>>, %arg6: memref<16x128xf32, #tpu.memory_space<vmem>>) attributes {dimension_semantics = [#tpu.dimension_semantics<parallel>], iteration_bounds = array<i64: 1>, scalar_prefetch = 0 : i64, scratch_operands = 0 : i64, tpu.core_type = #tpu.core_type<tc>, window_params = [{transform_indices = @transform_0, window_bounds = array<i64: 16, 128>}, {pipeline_mode = #tpu.pipeline_mode<synchronous>, transform_indices = @transform_1, window_bounds = array<i64: 128, 128>}, {pipeline_mode = #tpu.pipeline_mode<synchronous>, transform_indices = @transform_2, window_bounds = array<i64: 1, 128>}, {pipeline_mode = #tpu.pipeline_mode<synchronous>, transform_indices = @transform_3, window_bounds = array<i64: 128, 128>}, {pipeline_mode = #tpu.pipeline_mode<synchronous>, transform_indices = @transform_4, window_bounds = array<i64: 1, 128>}, {transform_indices = @transform_5, window_bounds = array<i64: 16, 128>}]} {
    %c0 = arith.constant 0 : index
    %c0_0 = arith.constant 0 : index
    %0 = vector.load %arg1[%c0, %c0_0] : memref<16x128xf32, #tpu.memory_space<vmem>>, vector<16x128xf32>
    %1 = arith.truncf %0 : vector<16x128xf32> to vector<16x128xbf16>
    %c0_1 = arith.constant 0 : index
    %c0_2 = arith.constant 0 : index
    %2 = vector.load %arg2[%c0_1, %c0_2] : memref<128x128xbf16, #tpu.memory_space<vmem>>, vector<128x128xbf16>
    %cst = arith.constant dense<0.000000e+00> : vector<16x128xf32>
    %3 = tpu.matmul %1, %2, %cst {dimension_numbers = #tpu.dot_dimension_numbers<[1], [0], [0], [1], [0, 0, 1, 1], [], []>} : vector<16x128xbf16>, vector<128x128xbf16>, vector<16x128xf32> -> vector<16x128xf32>
    %c0_3 = arith.constant 0 : index
    %c0_4 = arith.constant 0 : index
    %4 = vector.load %arg3[%c0_3, %c0_4] : memref<1x128xf32, #tpu.memory_space<vmem>>, vector<1x128xf32>
    %5 = vector.broadcast %4 : vector<1x128xf32> to vector<16x128xf32>
    %6 = arith.addf %3, %5 : vector<16x128xf32>
    %cst_5 = arith.constant 5.000000e-01 : f32
    %7 = vector.broadcast %cst_5 : f32 to vector<16x128xf32>
    %8 = arith.mulf %7, %6 : vector<16x128xf32>
    %cst_6 = arith.constant 1.41421354 : f32
    %9 = vector.broadcast %cst_6 : f32 to vector<16x128xf32>
    %10 = arith.divf %6, %9 : vector<16x128xf32>
    %11 = math.erf %10 : vector<16x128xf32>
    %cst_7 = arith.constant 1.000000e+00 : f32
    %12 = vector.broadcast %cst_7 : f32 to vector<16x128xf32>
    %13 = arith.addf %12, %11 : vector<16x128xf32>
    %14 = arith.mulf %8, %13 : vector<16x128xf32>
    %15 = arith.truncf %14 : vector<16x128xf32> to vector<16x128xbf16>
    %c0_8 = arith.constant 0 : index
    %c0_9 = arith.constant 0 : index
    %16 = vector.load %arg4[%c0_8, %c0_9] : memref<128x128xbf16, #tpu.memory_space<vmem>>, vector<128x128xbf16>
    %cst_10 = arith.constant dense<0.000000e+00> : vector<16x128xf32>
    %17 = tpu.matmul %15, %16, %cst_10 {dimension_numbers = #tpu.dot_dimension_numbers<[1], [0], [0], [1], [0, 0, 1, 1], [], []>} : vector<16x128xbf16>, vector<128x128xbf16>, vector<16x128xf32> -> vector<16x128xf32>
    %c0_11 = arith.constant 0 : index
    %c0_12 = arith.constant 0 : index
    %18 = vector.load %arg5[%c0_11, %c0_12] : memref<1x128xf32, #tpu.memory_space<vmem>>, vector<1x128xf32>
    %19 = vector.broadcast %18 : vector<1x128xf32> to vector<16x128xf32>
    %20 = arith.addf %17, %19 : vector<16x128xf32>
    %c0_13 = arith.constant 0 : index
    %c0_14 = arith.constant 0 : index
    %21 = vector.load %arg6[%c0_13, %c0_14] : memref<16x128xf32, #tpu.memory_space<vmem>>, vector<16x128xf32>
    tpu.vector_store %arg6[%c0_13, %c0_14], %20 {strides = array<i32>} : memref<16x128xf32, #tpu.memory_space<vmem>>, vector<16x128xf32>,
    return
  }
  func.func @transform_0(%arg0: i32) -> (i32, i32) {
    %c0_i32 = arith.constant 0 : i32
    %c0_i32_0 = arith.constant 0 : i32
    return %arg0, %c0_i32 : i32, i32
  }
  func.func @transform_1(%arg0: i32) -> (i32, i32) {
    %c0_i32 = arith.constant 0 : i32
    %c0_i32_0 = arith.constant 0 : i32
    %c0_i32_1 = arith.constant 0 : i32
    return %c0_i32, %c0_i32_0 : i32, i32
  }
  func.func @transform_2(%arg0: i32) -> (i32, i32) {
    %c0_i32 = arith.constant 0 : i32
    %c0_i32_0 = arith.constant 0 : i32
    %c0_i32_1 = arith.constant 0 : i32
    return %c0_i32, %c0_i32_0 : i32, i32
  }
  func.func @transform_3(%arg0: i32) -> (i32, i32) {
    %c0_i32 = arith.constant 0 : i32
    %c0_i32_0 = arith.constant 0 : i32
    %c0_i32_1 = arith.constant 0 : i32
    return %c0_i32, %c0_i32_0 : i32, i32
  }
  func.func @transform_4(%arg0: i32) -> (i32, i32) {
    %c0_i32 = arith.constant 0 : i32
    %c0_i32_0 = arith.constant 0 : i32
    %c0_i32_1 = arith.constant 0 : i32
    return %c0_i32, %c0_i32_0 : i32, i32
  }
  func.func @transform_5(%arg0: i32) -> (i32, i32) {
    %c0_i32 = arith.constant 0 : i32
    %c0_i32_0 = arith.constant 0 : i32
    return %arg0, %c0_i32 : i32, i32
  }
}

module attributes {stable_mosaic.version = 11 : i64} {
  func.func @mlp_kernel(%arg0: i32, %arg1: memref<16x128xf32, #tpu.memory_space<vmem>>, %arg2: memref<128x128xbf16, #tpu.memory_space<vmem>>, %arg3: memref<1x128xf32, #tpu.memory_space<vmem>>, %arg4: memref<128x128xbf16, #tpu.memory_space<vmem>>, %arg5: memref<1x128xf32, #tpu.memory_space<vmem>>, %arg6: memref<16x128xf32, #tpu.memory_space<vmem>>) attributes {dimension_semantics = [#tpu.dimension_semantics<parallel>], iteration_bounds = array<i64: 1>, scalar_prefetch = 0 : i64, scratch_operands = 0 : i64, tpu.core_type = #tpu.core_type<tc>, window_params = [{transform_indices = @transform_0, window_bounds = array<i64: 16, 128>}, {pipeline_mode = #tpu.pipeline_mode<synchronous>, transform_indices = @transform_1, window_bounds = array<i64: 128, 128>}, {pipeline_mode = #tpu.pipeline_mode<synchronous>, transform_indices = @transform_2, window_bounds = array<i64: 1, 128>}, {pipeline_mode = #tpu.pipeline_mode<synchronous>, transform_indices = @transform_3, window_bounds = array<i64: 128, 128>}, {pipeline_mode = #tpu.pipeline_mode<synchronous>, transform_indices = @transform_4, window_bounds = array<i64: 1, 128>}, {transform_indices = @transform_5, window_bounds = array<i64: 16, 128>}]} {
    %c0 = arith.constant 0 : index
    %c0_0 = arith.constant 0 : index
    %0 = vector.load %arg1[%c0, %c0_0] : memref<16x128xf32, #tpu.memory_space<vmem>>, vector<16x128xf32>
    %1 = arith.truncf %0 : vector<16x128xf32> to vector<16x128xbf16>
    %c0_1 = arith.constant 0 : index
    %c0_2 = arith.constant 0 : index
    %2 = vector.load %arg2[%c0_1, %c0_2] : memref<128x128xbf16, #tpu.memory_space<vmem>>, vector<128x128xbf16>
    %cst = arith.constant dense<0.000000e+00> : vector<16x128xf32>
    %3 = tpu.matmul %1, %2, %cst {dimension_numbers = #tpu.dot_dimension_numbers<[1], [0], [0], [1], [0, 0, 1, 1], [], []>} : vector<16x128xbf16>, vector<128x128xbf16>, vector<16x128xf32> -> vector<16x128xf32>
    %c0_3 = arith.constant 0 : index
    %c0_4 = arith.constant 0 : index
    %4 = vector.load %arg3[%c0_3, %c0_4] : memref<1x128xf32, #tpu.memory_space<vmem>>, vector<1x128xf32>
    %5 = vector.broadcast %4 : vector<1x128xf32> to vector<16x128xf32>
    %6 = arith.addf %3, %5 : vector<16x128xf32>
    %cst_5 = arith.constant 5.000000e-01 : f32
    %7 = vector.broadcast %cst_5 : f32 to vector<16x128xf32>
    %8 = arith.mulf %7, %6 : vector<16x128xf32>
    %cst_6 = arith.constant 1.41421354 : f32
    %9 = vector.broadcast %cst_6 : f32 to vector<16x128xf32>
    %10 = arith.divf %6, %9 : vector<16x128xf32>
    %11 = math.erf %10 : vector<16x128xf32>
    %cst_7 = arith.constant 1.000000e+00 : f32
    %12 = vector.broadcast %cst_7 : f32 to vector<16x128xf32>
    %13 = arith.addf %12, %11 : vector<16x128xf32>
    %14 = arith.mulf %8, %13 : vector<16x128xf32>
    %15 = arith.truncf %14 : vector<16x128xf32> to vector<16x128xbf16>
    %c0_8 = arith.constant 0 : index
    %c0_9 = arith.constant 0 : index
    %16 = vector.load %arg4[%c0_8, %c0_9] : memref<128x128xbf16, #tpu.memory_space<vmem>>, vector<128x128xbf16>
    %cst_10 = arith.constant dense<0.000000e+00> : vector<16x128xf32>
    %17 = tpu.matmul %15, %16, %cst_10 {dimension_numbers = #tpu.dot_dimension_numbers<[1], [0], [0], [1], [0, 0, 1, 1], [], []>} : vector<16x128xbf16>, vector<128x128xbf16>, vector<16x128xf32> -> vector<16x128xf32>
    %c0_11 = arith.constant 0 : index
    %c0_12 = arith.constant 0 : index
    %18 = vector.load %arg5[%c0_11, %c0_12] : memref<1x128xf32, #tpu.memory_space<vmem>>, vector<1x128xf32>
    %19 = vector.broadcast %18 : vector<1x128xf32> to vector<16x128xf32>
    %20 = arith.addf %17, %19 : vector<16x128xf32>
    %c0_13 = arith.constant 0 : index
    %c0_14 = arith.constant 0 : index
    %21 = vector.load %arg6[%c0_13, %c0_14] : memref<16x128xf32, #tpu.memory_space<vmem>>, vector<16x128xf32>
    tpu.vector_store %arg6[%c0_13, %c0_14], %20 {strides = array<i32>} : memref<16x128xf32, #tpu.memory_space<vmem>>, vector<16x128xf32>,
    return
  }
  func.func @transform_0(%arg0: i32) -> (i32, i32) {
    %c0_i32 = arith.constant 0 : i32
    %c0_i32_0 = arith.constant 0 : i32
    return %arg0, %c0_i32 : i32, i32
  }
  func.func @transform_1(%arg0: i32) -> (i32, i32) {
    %c0_i32 = arith.constant 0 : i32
    %c0_i32_0 = arith.constant 0 : i32
    %c0_i32_1 = arith.constant 0 : i32
    return %c0_i32, %c0_i32_0 : i32, i32
  }
  func.func @transform_2(%arg0: i32) -> (i32, i32) {
    %c0_i32 = arith.constant 0 : i32
    %c0_i32_0 = arith.constant 0 : i32
    %c0_i32_1 = arith.constant 0 : i32
    return %c0_i32, %c0_i32_0 : i32, i32
  }
  func.func @transform_3(%arg0: i32) -> (i32, i32) {
    %c0_i32 = arith.constant 0 : i32
    %c0_i32_0 = arith.constant 0 : i32
    %c0_i32_1 = arith.constant 0 : i32
    return %c0_i32, %c0_i32_0 : i32, i32
  }
  func.func @transform_4(%arg0: i32) -> (i32, i32) {
    %c0_i32 = arith.constant 0 : i32
    %c0_i32_0 = arith.constant 0 : i32
    %c0_i32_1 = arith.constant 0 : i32
    return %c0_i32, %c0_i32_0 : i32, i32
  }
  func.func @transform_5(%arg0: i32) -> (i32, i32) {
    %c0_i32 = arith.constant 0 : i32
    %c0_i32_0 = arith.constant 0 : i32
    return %arg0, %c0_i32 : i32, i32
  }
}

</mosaic_0001>

<bundles_post_ra>
// kernel: _mlp_pallas.1
= control target key start
LH: loop header
LB: loop body
LE: loop exit
PB: predicated region body
PF: predicated region fallthrough
CT: control target
= control target key end

     0   :  { %10 = vsyncpa [#allocation3], 0  ;;  %s714_s0 = inlined_call_operand.hbm [shape: f32[16,128], index: 0, kind: input, shape index: {}]   ;;  %s715_s1 = inlined_call_operand.hbm [shape: bf16[128,128], index: 1, kind: input, shape index: {}]   ;;  %s716_s2 = inlined_call_operand.hbm [shape: f32[1,128], index: 2, kind: input, shape index: {}]   ;;  %s717_s3 = inlined_call_operand.hbm [shape: bf16[128,128], index: 3, kind: input, shape index: {}]   ;;  %s718_s4 = inlined_call_operand.hbm [shape: f32[1,128], index: 4, kind: input, shape index: {}]   ;;  %s719_s5 = inlined_call_operand.hbm [shape: f32[16,128], index: 5, kind: output, shape index: {}]  }
   0x1   :  { %11 = vsyncpa [#allocation6], 0 }
   0x2   :  { %12 = vsyncpa [#allocation9], 0 }
   0x3   :  { %13 = vsyncpa [#allocation4], 0  ;;  %s594_s18 = smov [#allocation5]   ;;  %s454_s22 = scalar_lea.hbm %s715_s1, 1024 }
   0x4   :  { %s31_s19 = sshll.u32 %s594_s18, 4  ;;  %p455_p0 = scmp.ne.s32.totalorder %s715_s1, %s454_s22  ;;  %s32_s19 = int_to_ptr.vmem [resolvable:$true] %s31_s19 }
   0x5   :  { %p458_p1 = scmp.lt.u32.totalorder %s454_s22, %s715_s1 }
   0x7   :  { %p460_p2 = pnand %p458_p1, %p455_p0 }
   0x9   :  { %463 = shalt.err (!%p460_p2)
}
   0xa   :  { %s464_s27 = scalar_lea.vmem %s32_s19, 1024  ;;  %p469_p4 = scmp.lt.s32.totalorder %s32_s19, %s32_s19 }
   0xb   :  { %p465_p3 = scmp.ne.s32.totalorder %s32_s19, %s464_s27  ;;  %p470_p5 = scmp.lt.s32.totalorder %s464_s27, %s464_s27 }
   0xd   :  { %p471_p6 = por %p470_p5, %p469_p4 }
   0xf   :  { %p472_p7 = pnand %p471_p6, %p465_p3 }
  0x11   :  { %475 = shalt.err (!%p472_p7)
}
  0x12   :  { %s595_s28 = smov 64   ;;  %s596_s29 = smov 4  }
  0x13   :  { %37 = dma.hbm_to_vmem [thread:$0]  %s715_s1, 1024, %s32_s19, [#allocation6], %s595_s28, %s595_s28, %s596_s29  }
  0x14   :  { %s597_s7 = smov [#allocation8]   ;;  %s598_s9 = smov [#allocation2]  }
  0x15   :  { %s53_s8 = sshll.u32 %s597_s7, 4  ;;  %s19_s10 = sshll.u32 %s598_s9, 4  ;;  %s54_s8 = int_to_ptr.vmem [resolvable:$true] %s53_s8  ;;  %s20_s10 = int_to_ptr.vmem [resolvable:$true] %s19_s10 }
  0x16   :  { %s476_s13 = scalar_lea.hbm %s717_s3, 1024 }
  0x17   :  { %p477_p8 = scmp.ne.s32.totalorder %s717_s3, %s476_s13  ;;  %p480_p9 = scmp.lt.u32.totalorder %s476_s13, %s717_s3 }
  0x19   :  { %p482_p10 = pnand %p480_p9, %p477_p8 }
  0x1b   :  { %485 = shalt.err (!%p482_p10)
}
  0x1c   :  { %s486_s1 = scalar_lea.vmem %s54_s8, 1024  ;;  %p491_p12 = scmp.lt.s32.totalorder %s54_s8, %s54_s8 }
  0x1d   :  { %p487_p11 = scmp.ne.s32.totalorder %s54_s8, %s486_s1  ;;  %p492_p13 = scmp.lt.s32.totalorder %s486_s1, %s486_s1 }
  0x1f   :  { %p493_p0 = por %p492_p13, %p491_p12 }
  0x21   :  { %p494_p1 = pnand %p493_p0, %p487_p11 }
  0x23   :  { %497 = shalt.err (!%p494_p1)
}
  0x24   :  { %59 = dma.hbm_to_vmem [thread:$0]  %s717_s3, 1024, %s54_s8, [#allocation9], %s595_s28, %s595_s28, %s596_s29  }
  0x25   :  { %s498_s22 = scalar_lea.hbm %s714_s0, 256 }
  0x26   :  { %p499_p2 = scmp.ne.s32.totalorder %s714_s0, %s498_s22  ;;  %p502_p3 = scmp.lt.u32.totalorder %s498_s22, %s714_s0 }
  0x28   :  { %p504_p4 = pnand %p502_p3, %p499_p2 }
  0x2a   :  { %507 = shalt.err (!%p504_p4)
}
  0x2b   :  { %s508_s27 = scalar_lea.vmem %s20_s10, 256  ;;  %p513_p6 = scmp.lt.s32.totalorder %s20_s10, %s20_s10 }
  0x2c   :  { %p509_p5 = scmp.ne.s32.totalorder %s20_s10, %s508_s27  ;;  %p514_p7 = scmp.lt.s32.totalorder %s508_s27, %s508_s27 }
  0x2e   :  { %p515_p8 = por %p514_p7, %p513_p6 }
  0x30   :  { %p516_p9 = pnand %p515_p8, %p509_p5 }
  0x32   :  { %519 = shalt.err (!%p516_p9)
}
  0x33   :  { %s599_s3 = smov 128   ;;  %s600_s28 = smov 8  }
  0x34   :  { %25 = dma.hbm_to_vmem [thread:$0]  %s714_s0, 256, %s20_s10, [#allocation3], %s599_s3, %s599_s3, %s600_s28  }
  0x35   :  { %s601_s6 = smov [#allocation7]   ;;  %s602_s8 = smov [#allocation10]  }
  0x36   :  { %s44_s7 = sshll.u32 %s601_s6, 4  ;;  %s66_s9 = sshll.u32 %s602_s8, 4  ;;  %s45_s7 = int_to_ptr.vmem [resolvable:$true] %s44_s7  ;;  %s67_s9 = int_to_ptr.vmem [resolvable:$true] %s66_s9 }
  0x37   :  { %s520_s13 = scalar_lea.hbm %s716_s2, 16 }
  0x38   :  { %p521_p10 = scmp.ne.s32.totalorder %s716_s2, %s520_s13  ;;  %p524_p11 = scmp.lt.u32.totalorder %s520_s13, %s716_s2 }
  0x3a   :  { %p526_p12 = pnand %p524_p11, %p521_p10 }
  0x3c   :  { %529 = shalt.err (!%p526_p12)
}
  0x3d   :  { %s530_s0 = scalar_lea.vmem %s45_s7, 16  ;;  %s534_s10 = scalar_lea.vmem %s45_s7, 32 }
  0x3e   :  { %p531_p13 = scmp.ne.s32.totalorder %s45_s7, %s530_s0  ;;  %p535_p0 = scmp.lt.s32.totalorder %s45_s7, %s45_s7 }
  0x3f   :  { %p536_p1 = scmp.lt.s32.totalorder %s534_s10, %s530_s0 }
  0x41   :  { %p537_p2 = por %p536_p1, %p535_p0 }
  0x43   :  { %p538_p3 = pnand %p537_p2, %p531_p13 }
  0x45   :  { %541 = shalt.err (!%p538_p3)
}
  0x46   :  { %47 = dma.hbm_to_vmem [thread:$0]  %s716_s2, 16, %s45_s7, [#allocation6]  }
  0x47   :  { %s542_s21 = scalar_lea.hbm %s718_s4, 16 }
  0x48   :  { %p543_p4 = scmp.ne.s32.totalorder %s718_s4, %s542_s21  ;;  %p546_p5 = scmp.lt.u32.totalorder %s542_s21, %s718_s4 }
  0x4a   :  { %p548_p6 = pnand %p546_p5, %p543_p4 }
  0x4c   :  { %551 = shalt.err (!%p548_p6)
}
  0x4d   :  { %s552_s26 = scalar_lea.vmem %s67_s9, 16  ;;  %s556_s27 = scalar_lea.vmem %s67_s9, 32 }
  0x4e   :  { %p553_p7 = scmp.ne.s32.totalorder %s67_s9, %s552_s26  ;;  %p557_p8 = scmp.lt.s32.totalorder %s67_s9, %s67_s9 }
  0x4f   :  { %p558_p9 = scmp.lt.s32.totalorder %s556_s27, %s552_s26 }
  0x51   :  { %p559_p10 = por %p558_p9, %p557_p8 }
  0x53   :  { %p560_p11 = pnand %p559_p10, %p553_p7 }
  0x55   :  { %563 = shalt.err (!%p560_p11)
}
  0x56   :  { %69 = dma.hbm_to_vmem [thread:$0]  %s718_s4, 16, %s67_s9, [#allocation9]  }
  0x57   :  { %586 = dma.done.wait [#allocation3], 256  }
  0x58   :  { %587 = vsyncadd [#allocation3], 4294967040 }
  0x59   :  { %588 = dma.done.wait [#allocation6], 1040  }
  0x5a   :  { %589 = vsyncadd [#allocation6], 4294966256 }
  0x5b   :  { %590 = dma.done.wait [#allocation9], 1040  }
  0x5c   :  { %591 = vsyncadd [#allocation9], 4294966256  ;;  %v603_v0 = vmov 0.0   ;;  %vm604_vm0 = vmmov 0   ;;  %v434_v1 = vld [vmem:[#allocation5] sm:$0xff]   ;;  %v435_v2 = vld [vmem:[#allocation5 + $0x8] sm:$0xff]  }
  0x5d   :  { %382 = vmatprep.subr.bf16.mxu0 %v603_v0  ;;  %398 = vmatprep.mubr.msk.bf16.mxu0 %vm604_vm0, %v603_v0  ;;  %v436_v3 = vld [vmem:[#allocation5 + $0x10] sm:$0xff]   ;;  %v442_v4 = vld [vmem:[#allocation8] sm:$0xff]   ;;  %v437_v5 = vld [vmem:[#allocation5 + $0x18] sm:$0xff]   ;;  %s605_s4 = smov [#allocation11]  }
  0x5e   :  { %402 = vmatprep.subr.bf16.mxu1 %v603_v0  ;;  %418 = vmatprep.mubr.msk.bf16.mxu1 %vm604_vm0, %v603_v0  ;;  %v443_v6 = vld [vmem:[#allocation8 + $0x8] sm:$0xff]   ;;  %v438_v7 = vld [vmem:[#allocation5 + $0x20] sm:$0xff]   ;;  %v441_v10 = vld [vmem:[#allocation5 + $0x38] sm:$0xff]   ;;  %s332_s30 = sshll.u32 %s605_s4, 4  ;;  %s333_s30 = int_to_ptr.vmem [resolvable:$true] %s332_s30 }
  0x5f   :  { %383 = vmatpush3.bf16.msra.mxu0 %v434_v1  ;;  %403 = vmatpush3.bf16.msra.mxu1 %v442_v4  ;;  %v439_v8 = vld [vmem:[#allocation5 + $0x28] sm:$0xff]   ;;  %v440_v9 = vld [vmem:[#allocation5 + $0x30] sm:$0xff]   ;;  %v87_v12 = vld [vmem:[#allocation2 + $0x8] sm:$0xff]  ;;  %s564_s6 = scalar_lea.vmem %s333_s30, 256  ;;  %p569_p13 = scmp.lt.s32.totalorder %s333_s30, %s333_s30 }
  0x60   :  { %384 = vmatprep.subr.bf16.mxu0 %v603_v0  ;;  %404 = vmatprep.subr.bf16.mxu1 %v603_v0  ;;  %v86_v11 = vld [vmem:[#allocation2] sm:$0xff]  ;;  %v445_v15 = vld [vmem:[#allocation8 + $0x18] sm:$0xff]   ;;  %v446_v16 = vld [vmem:[#allocation8 + $0x20] sm:$0xff]   ;;  %p565_p12 = scmp.ne.s32.totalorder %s333_s30, %s564_s6  ;;  %p570_p0 = scmp.lt.s32.totalorder %s564_s6, %s564_s6 }
  0x61   :  { %v88_v13 = vpack.c.bf16 %v87_v12, %v86_v11  ;;  %v444_v14 = vld [vmem:[#allocation8 + $0x10] sm:$0xff]   ;;  %v447_v17 = vld [vmem:[#allocation8 + $0x28] sm:$0xff]   ;;  %v449_v19 = vld [vmem:[#allocation8 + $0x38] sm:$0xff]  }
  0x62   :  { %v448_v18 = vld [vmem:[#allocation8 + $0x30] sm:$0xff]   ;;  %v346_v20 = vld [vmem:[#allocation7] ss:$0 sm:$0xff]  ;;  %v355_v38 = vld [vmem:[#allocation10] ss:$0 sm:$0xff]  ;;  %p571_p1 = por %p570_p0, %p569_p13 }
  0x63   :  { %385 = vmatpush3.bf16.msra.mxu0 %v435_v2  ;;  %405 = vmatpush3.bf16.msra.mxu1 %v443_v6 }
  0x64   :  { %386 = vmatprep.subr.bf16.mxu0 %v603_v0  ;;  %406 = vmatprep.subr.bf16.mxu1 %v603_v0  ;;  %p572_p2 = pnand %p571_p1, %p565_p12 }
  0x67   :  { %387 = vmatpush3.bf16.msra.mxu0 %v436_v3  ;;  %407 = vmatpush3.bf16.msra.mxu1 %v444_v14 }
  0x68   :  { %388 = vmatprep.subr.bf16.mxu0 %v603_v0  ;;  %408 = vmatprep.subr.bf16.mxu1 %v603_v0 }
  0x6b   :  { %389 = vmatpush3.bf16.msra.mxu0 %v437_v5  ;;  %409 = vmatpush3.bf16.msra.mxu1 %v445_v15 }
  0x6c   :  { %390 = vmatprep.subr.bf16.mxu0 %v603_v0  ;;  %410 = vmatprep.subr.bf16.mxu1 %v603_v0 }
  0x6f   :  { %391 = vmatpush3.bf16.msra.mxu0 %v438_v7  ;;  %411 = vmatpush3.bf16.msra.mxu1 %v446_v16 }
  0x70   :  { %392 = vmatprep.subr.bf16.mxu0 %v603_v0  ;;  %412 = vmatprep.subr.bf16.mxu1 %v603_v0 }
  0x73   :  { %393 = vmatpush3.bf16.msra.mxu0 %v439_v8  ;;  %413 = vmatpush3.bf16.msra.mxu1 %v447_v17 }
  0x74   :  { %394 = vmatprep.subr.bf16.mxu0 %v603_v0  ;;  %414 = vmatprep.subr.bf16.mxu1 %v603_v0 }
  0x77   :  { %395 = vmatpush3.bf16.msra.mxu0 %v440_v9  ;;  %415 = vmatpush3.bf16.msra.mxu1 %v448_v18 }
  0x78   :  { %396 = vmatprep.subr.bf16.mxu0 %v603_v0  ;;  %416 = vmatprep.subr.bf16.mxu1 %v603_v0 }
  0x7b   :  { %397 = vmatpush3.bf16.msra.mxu0 %v441_v10  ;;  %417 = vmatpush3.bf16.msra.mxu1 %v449_v19 }
  0x7e   :  { %399 = vmatmul.mubr.bf16.vlgmr.msra.gmra.mrb[0].mxu0 %v88_v13 }
 0x151   :  { %v194_v21 = vpop.f32.mrb[0].mxu0 }
 0x152   :  { %v195_v22 = vadd.f32 %v346_v20, %v194_v21  ;;  %v400_v23 = vpop.f32.mrb[1].mxu0 }
 0x153   :  { %v197_v24 = vpop.f32.mrb[2].mxu0 }
 0x154   :  { %v204_v25 = vmul.f32 0.70710677, %v195_v22  ;;  %v198_v26 = vadd.f32 %v346_v20, %v197_v24  ;;  %v401_v27 = vpop.f32.mrb[3].mxu0  ;;  %v201_v32 = vmul.f32 0.5, %v195_v22 }
 0x156   :  { %450 = verf.f32 %v204_v25  ;;  %v205_v28 = vmul.f32 0.70710677, %v198_v26  ;;  %v202_v33 = vmul.f32 0.5, %v198_v26 }
 0x158   :  { %452 = verf.f32 %v205_v28 }
 0x160   :  { %v451_v29 = vpop.eup %450 }
 0x161   :  { %v208_v30 = vadd.f32 1.0, %v451_v29 }
 0x162   :  { %v453_v31 = vpop.eup %452 }
 0x163   :  { %v209_v34 = vadd.f32 1.0, %v453_v31  ;;  %v210_v35 = vmul.f32 %v208_v30, %v201_v32 }
 0x165   :  { %v211_v36 = vmul.f32 %v209_v34, %v202_v33 }
 0x167   :  { %v212_v37 = vpack.c.bf16 %v211_v36, %v210_v35 }
 0x169   :  { %419 = vmatmul.mubr.bf16.vlgmr.msra.gmra.mrb[0].mxu1 %v212_v37 }
 0x23c   :  { %v318_v39 = vpop.f32.mrb[0].mxu1 }
 0x23d   :  { %v319_v40 = vadd.f32 %v355_v38, %v318_v39  ;;  %v420_v41 = vpop.f32.mrb[1].mxu1 }
 0x23e   :  { %v321_v42 = vpop.f32.mrb[2].mxu1 }
 0x23f   :  { %325 = vst [vmem:[#allocation11] sm:$0xff] %v319_v40  ;;  %v322_v43 = vadd.f32 %v355_v38, %v321_v42  ;;  %v421_v44 = vpop.f32.mrb[3].mxu1 }
 0x241   :  { %326 = vst [vmem:[#allocation11 + $0x8] sm:$0xff] %v322_v43 }
 0x242   :  { %575 = shalt.err (!%p572_p2)
}
 0x243   :  { %s576_s9 = scalar_lea.hbm %s719_s5, 256 }
 0x244   :  { %p577_p3 = scmp.ne.s32.totalorder %s719_s5, %s576_s9  ;;  %p580_p4 = scmp.lt.u32.totalorder %s576_s9, %s719_s5 }
 0x246   :  { %p582_p5 = pnand %p580_p4, %p577_p3 }
 0x248   :  { %585 = shalt.err (!%p582_p5)
}
 0x249   :  { %338 = dma.vmem_to_hbm [thread:$0]  %s333_s30, 256, %s719_s5, [#allocation4], %s599_s3, %s599_s3, %s600_s28  }
 0x24a   :  { %592 = dma.done.wait [#allocation4], 256  }
 0x24b   :  { %593 = vsyncadd [#allocation4], 4294967040 }
 0x24c   :  { %342 = vsyncpa [#allocation3], 1 }
 0x24d   :  { %343 = vsyncpa [#allocation6], 1 }
 0x24e   :  { %344 = vsyncpa [#allocation9], 1 }
 0x24f   :  { %345 = vsyncpa [#allocation4], 1 }

// kernel: _mlp_pallas.1
= control target key start
LH: loop header
LB: loop body
LE: loop exit
PB: predicated region body
PF: predicated region fallthrough
CT: control target
= control target key end

     0   :  { %10 = vsyncpa [#allocation3], 0  ;;  %s714_s0 = inlined_call_operand.hbm [shape: f32[16,128], index: 0, kind: input, shape index: {}]   ;;  %s715_s1 = inlined_call_operand.hbm [shape: bf16[128,128], index: 1, kind: input, shape index: {}]   ;;  %s716_s2 = inlined_call_operand.hbm [shape: f32[1,128], index: 2, kind: input, shape index: {}]   ;;  %s717_s3 = inlined_call_operand.hbm [shape: bf16[128,128], index: 3, kind: input, shape index: {}]   ;;  %s718_s4 = inlined_call_operand.hbm [shape: f32[1,128], index: 4, kind: input, shape index: {}]   ;;  %s719_s5 = inlined_call_operand.hbm [shape: f32[16,128], index: 5, kind: output, shape index: {}]  }
   0x1   :  { %11 = vsyncpa [#allocation6], 0 }
   0x2   :  { %12 = vsyncpa [#allocation9], 0 }
   0x3   :  { %13 = vsyncpa [#allocation4], 0  ;;  %s594_s18 = smov [#allocation5]   ;;  %s454_s22 = scalar_lea.hbm %s715_s1, 1024 }
   0x4   :  { %s31_s19 = sshll.u32 %s594_s18, 4  ;;  %p455_p0 = scmp.ne.s32.totalorder %s715_s1, %s454_s22  ;;  %s32_s19 = int_to_ptr.vmem [resolvable:$true] %s31_s19 }
   0x5   :  { %p458_p1 = scmp.lt.u32.totalorder %s454_s22, %s715_s1 }
   0x7   :  { %p460_p2 = pnand %p458_p1, %p455_p0 }
   0x9   :  { %463 = shalt.err (!%p460_p2)
}
   0xa   :  { %s464_s27 = scalar_lea.vmem %s32_s19, 1024  ;;  %p469_p4 = scmp.lt.s32.totalorder %s32_s19, %s32_s19 }
   0xb   :  { %p465_p3 = scmp.ne.s32.totalorder %s32_s19, %s464_s27  ;;  %p470_p5 = scmp.lt.s32.totalorder %s464_s27, %s464_s27 }
   0xd   :  { %p471_p6 = por %p470_p5, %p469_p4 }
   0xf   :  { %p472_p7 = pnand %p471_p6, %p465_p3 }
  0x11   :  { %475 = shalt.err (!%p472_p7)
}
  0x12   :  { %s595_s28 = smov 64   ;;  %s596_s29 = smov 4  }
  0x13   :  { %37 = dma.hbm_to_vmem [thread:$0]  %s715_s1, 1024, %s32_s19, [#allocation6], %s595_s28, %s595_s28, %s596_s29  }
  0x14   :  { %s597_s7 = smov [#allocation8]   ;;  %s598_s9 = smov [#allocation2]  }
  0x15   :  { %s53_s8 = sshll.u32 %s597_s7, 4  ;;  %s19_s10 = sshll.u32 %s598_s9, 4  ;;  %s54_s8 = int_to_ptr.vmem [resolvable:$true] %s53_s8  ;;  %s20_s10 = int_to_ptr.vmem [resolvable:$true] %s19_s10 }
  0x16   :  { %s476_s13 = scalar_lea.hbm %s717_s3, 1024 }
  0x17   :  { %p477_p8 = scmp.ne.s32.totalorder %s717_s3, %s476_s13  ;;  %p480_p9 = scmp.lt.u32.totalorder %s476_s13, %s717_s3 }
  0x19   :  { %p482_p10 = pnand %p480_p9, %p477_p8 }
  0x1b   :  { %485 = shalt.err (!%p482_p10)
}
  0x1c   :  { %s486_s1 = scalar_lea.vmem %s54_s8, 1024  ;;  %p491_p12 = scmp.lt.s32.totalorder %s54_s8, %s54_s8 }
  0x1d   :  { %p487_p11 = scmp.ne.s32.totalorder %s54_s8, %s486_s1  ;;  %p492_p13 = scmp.lt.s32.totalorder %s486_s1, %s486_s1 }
  0x1f   :  { %p493_p0 = por %p492_p13, %p491_p12 }
  0x21   :  { %p494_p1 = pnand %p493_p0, %p487_p11 }
  0x23   :  { %497 = shalt.err (!%p494_p1)
}
  0x24   :  { %59 = dma.hbm_to_vmem [thread:$0]  %s717_s3, 1024, %s54_s8, [#allocation9], %s595_s28, %s595_s28, %s596_s29  }
  0x25   :  { %s498_s22 = scalar_lea.hbm %s714_s0, 256 }
  0x26   :  { %p499_p2 = scmp.ne.s32.totalorder %s714_s0, %s498_s22  ;;  %p502_p3 = scmp.lt.u32.totalorder %s498_s22, %s714_s0 }
  0x28   :  { %p504_p4 = pnand %p502_p3, %p499_p2 }
  0x2a   :  { %507 = shalt.err (!%p504_p4)
}
  0x2b   :  { %s508_s27 = scalar_lea.vmem %s20_s10, 256  ;;  %p513_p6 = scmp.lt.s32.totalorder %s20_s10, %s20_s10 }
  0x2c   :  { %p509_p5 = scmp.ne.s32.totalorder %s20_s10, %s508_s27  ;;  %p514_p7 = scmp.lt.s32.totalorder %s508_s27, %s508_s27 }
  0x2e   :  { %p515_p8 = por %p514_p7, %p513_p6 }
  0x30   :  { %p516_p9 = pnand %p515_p8, %p509_p5 }
  0x32   :  { %519 = shalt.err (!%p516_p9)
}
  0x33   :  { %s599_s3 = smov 128   ;;  %s600_s28 = smov 8  }
  0x34   :  { %25 = dma.hbm_to_vmem [thread:$0]  %s714_s0, 256, %s20_s10, [#allocation3], %s599_s3, %s599_s3, %s600_s28  }
  0x35   :  { %s601_s6 = smov [#allocation7]   ;;  %s602_s8 = smov [#allocation10]  }
  0x36   :  { %s44_s7 = sshll.u32 %s601_s6, 4  ;;  %s66_s9 = sshll.u32 %s602_s8, 4  ;;  %s45_s7 = int_to_ptr.vmem [resolvable:$true] %s44_s7  ;;  %s67_s9 = int_to_ptr.vmem [resolvable:$true] %s66_s9 }
  0x37   :  { %s520_s13 = scalar_lea.hbm %s716_s2, 16 }
  0x38   :  { %p521_p10 = scmp.ne.s32.totalorder %s716_s2, %s520_s13  ;;  %p524_p11 = scmp.lt.u32.totalorder %s520_s13, %s716_s2 }
  0x3a   :  { %p526_p12 = pnand %p524_p11, %p521_p10 }
  0x3c   :  { %529 = shalt.err (!%p526_p12)
}
  0x3d   :  { %s530_s0 = scalar_lea.vmem %s45_s7, 16  ;;  %s534_s10 = scalar_lea.vmem %s45_s7, 32 }
  0x3e   :  { %p531_p13 = scmp.ne.s32.totalorder %s45_s7, %s530_s0  ;;  %p535_p0 = scmp.lt.s32.totalorder %s45_s7, %s45_s7 }
  0x3f   :  { %p536_p1 = scmp.lt.s32.totalorder %s534_s10, %s530_s0 }
  0x41   :  { %p537_p2 = por %p536_p1, %p535_p0 }
  0x43   :  { %p538_p3 = pnand %p537_p2, %p531_p13 }
  0x45   :  { %541 = shalt.err (!%p538_p3)
}
  0x46   :  { %47 = dma.hbm_to_vmem [thread:$0]  %s716_s2, 16, %s45_s7, [#allocation6]  }
  0x47   :  { %s542_s21 = scalar_lea.hbm %s718_s4, 16 }
  0x48   :  { %p543_p4 = scmp.ne.s32.totalorder %s718_s4, %s542_s21  ;;  %p546_p5 = scmp.lt.u32.totalorder %s542_s21, %s718_s4 }
  0x4a   :  { %p548_p6 = pnand %p546_p5, %p543_p4 }
  0x4c   :  { %551 = shalt.err (!%p548_p6)
}
  0x4d   :  { %s552_s26 = scalar_lea.vmem %s67_s9, 16  ;;  %s556_s27 = scalar_lea.vmem %s67_s9, 32 }
  0x4e   :  { %p553_p7 = scmp.ne.s32.totalorder %s67_s9, %s552_s26  ;;  %p557_p8 = scmp.lt.s32.totalorder %s67_s9, %s67_s9 }
  0x4f   :  { %p558_p9 = scmp.lt.s32.totalorder %s556_s27, %s552_s26 }
  0x51   :  { %p559_p10 = por %p558_p9, %p557_p8 }
  0x53   :  { %p560_p11 = pnand %p559_p10, %p553_p7 }
  0x55   :  { %563 = shalt.err (!%p560_p11)
}
  0x56   :  { %69 = dma.hbm_to_vmem [thread:$0]  %s718_s4, 16, %s67_s9, [#allocation9]  }
  0x57   :  { %586 = dma.done.wait [#allocation3], 256  }
  0x58   :  { %587 = vsyncadd [#allocation3], 4294967040 }
  0x59   :  { %588 = dma.done.wait [#allocation6], 1040  }
  0x5a   :  { %589 = vsyncadd [#allocation6], 4294966256 }
  0x5b   :  { %590 = dma.done.wait [#allocation9], 1040  }
  0x5c   :  { %591 = vsyncadd [#allocation9], 4294966256  ;;  %v603_v0 = vmov 0.0   ;;  %vm604_vm0 = vmmov 0   ;;  %v434_v1 = vld [vmem:[#allocation5] sm:$0xff]   ;;  %v435_v2 = vld [vmem:[#allocation5 + $0x8] sm:$0xff]  }
  0x5d   :  { %382 = vmatprep.subr.bf16.mxu0 %v603_v0  ;;  %398 = vmatprep.mubr.msk.bf16.mxu0 %vm604_vm0, %v603_v0  ;;  %v436_v3 = vld [vmem:[#allocation5 + $0x10] sm:$0xff]   ;;  %v442_v4 = vld [vmem:[#allocation8] sm:$0xff]   ;;  %v437_v5 = vld [vmem:[#allocation5 + $0x18] sm:$0xff]   ;;  %s605_s4 = smov [#allocation11]  }
  0x5e   :  { %402 = vmatprep.subr.bf16.mxu1 %v603_v0  ;;  %418 = vmatprep.mubr.msk.bf16.mxu1 %vm604_vm0, %v603_v0  ;;  %v443_v6 = vld [vmem:[#allocation8 + $0x8] sm:$0xff]   ;;  %v438_v7 = vld [vmem:[#allocation5 + $0x20] sm:$0xff]   ;;  %v441_v10 = vld [vmem:[#allocation5 + $0x38] sm:$0xff]   ;;  %s332_s30 = sshll.u32 %s605_s4, 4  ;;  %s333_s30 = int_to_ptr.vmem [resolvable:$true] %s332_s30 }
  0x5f   :  { %383 = vmatpush3.bf16.msra.mxu0 %v434_v1  ;;  %403 = vmatpush3.bf16.msra.mxu1 %v442_v4  ;;  %v439_v8 = vld [vmem:[#allocation5 + $0x28] sm:$0xff]   ;;  %v440_v9 = vld [vmem:[#allocation5 + $0x30] sm:$0xff]   ;;  %v87_v12 = vld [vmem:[#allocation2 + $0x8] sm:$0xff]  ;;  %s564_s6 = scalar_lea.vmem %s333_s30, 256  ;;  %p569_p13 = scmp.lt.s32.totalorder %s333_s30, %s333_s30 }
  0x60   :  { %384 = vmatprep.subr.bf16.mxu0 %v603_v0  ;;  %404 = vmatprep.subr.bf16.mxu1 %v603_v0  ;;  %v86_v11 = vld [vmem:[#allocation2] sm:$0xff]  ;;  %v445_v15 = vld [vmem:[#allocation8 + $0x18] sm:$0xff]   ;;  %v446_v16 = vld [vmem:[#allocation8 + $0x20] sm:$0xff]   ;;  %p565_p12 = scmp.ne.s32.totalorder %s333_s30, %s564_s6  ;;  %p570_p0 = scmp.lt.s32.totalorder %s564_s6, %s564_s6 }
  0x61   :  { %v88_v13 = vpack.c.bf16 %v87_v12, %v86_v11  ;;  %v444_v14 = vld [vmem:[#allocation8 + $0x10] sm:$0xff]   ;;  %v447_v17 = vld [vmem:[#allocation8 + $0x28] sm:$0xff]   ;;  %v449_v19 = vld [vmem:[#allocation8 + $0x38] sm:$0xff]  }
  0x62   :  { %v448_v18 = vld [vmem:[#allocation8 + $0x30] sm:$0xff]   ;;  %v346_v20 = vld [vmem:[#allocation7] ss:$0 sm:$0xff]  ;;  %v355_v38 = vld [vmem:[#allocation10] ss:$0 sm:$0xff]  ;;  %p571_p1 = por %p570_p0, %p569_p13 }
  0x63   :  { %385 = vmatpush3.bf16.msra.mxu0 %v435_v2  ;;  %405 = vmatpush3.bf16.msra.mxu1 %v443_v6 }
  0x64   :  { %386 = vmatprep.subr.bf16.mxu0 %v603_v0  ;;  %406 = vmatprep.subr.bf16.mxu1 %v603_v0  ;;  %p572_p2 = pnand %p571_p1, %p565_p12 }
  0x67   :  { %387 = vmatpush3.bf16.msra.mxu0 %v436_v3  ;;  %407 = vmatpush3.bf16.msra.mxu1 %v444_v14 }
  0x68   :  { %388 = vmatprep.subr.bf16.mxu0 %v603_v0  ;;  %408 = vmatprep.subr.bf16.mxu1 %v603_v0 }
  0x6b   :  { %389 = vmatpush3.bf16.msra.mxu0 %v437_v5  ;;  %409 = vmatpush3.bf16.msra.mxu1 %v445_v15 }
  0x6c   :  { %390 = vmatprep.subr.bf16.mxu0 %v603_v0  ;;  %410 = vmatprep.subr.bf16.mxu1 %v603_v0 }
  0x6f   :  { %391 = vmatpush3.bf16.msra.mxu0 %v438_v7  ;;  %411 = vmatpush3.bf16.msra.mxu1 %v446_v16 }
  0x70   :  { %392 = vmatprep.subr.bf16.mxu0 %v603_v0  ;;  %412 = vmatprep.subr.bf16.mxu1 %v603_v0 }
  0x73   :  { %393 = vmatpush3.bf16.msra.mxu0 %v439_v8  ;;  %413 = vmatpush3.bf16.msra.mxu1 %v447_v17 }
  0x74   :  { %394 = vmatprep.subr.bf16.mxu0 %v603_v0  ;;  %414 = vmatprep.subr.bf16.mxu1 %v603_v0 }
  0x77   :  { %395 = vmatpush3.bf16.msra.mxu0 %v440_v9  ;;  %415 = vmatpush3.bf16.msra.mxu1 %v448_v18 }
  0x78   :  { %396 = vmatprep.subr.bf16.mxu0 %v603_v0  ;;  %416 = vmatprep.subr.bf16.mxu1 %v603_v0 }
  0x7b   :  { %397 = vmatpush3.bf16.msra.mxu0 %v441_v10  ;;  %417 = vmatpush3.bf16.msra.mxu1 %v449_v19 }
  0x7e   :  { %399 = vmatmul.mubr.bf16.vlgmr.msra.gmra.mrb[0].mxu0 %v88_v13 }
 0x151   :  { %v194_v21 = vpop.f32.mrb[0].mxu0 }
 0x152   :  { %v195_v22 = vadd.f32 %v346_v20, %v194_v21  ;;  %v400_v23 = vpop.f32.mrb[1].mxu0 }
 0x153   :  { %v197_v24 = vpop.f32.mrb[2].mxu0 }
 0x154   :  { %v204_v25 = vmul.f32 0.70710677, %v195_v22  ;;  %v198_v26 = vadd.f32 %v346_v20, %v197_v24  ;;  %v401_v27 = vpop.f32.mrb[3].mxu0  ;;  %v201_v32 = vmul.f32 0.5, %v195_v22 }
 0x156   :  { %450 = verf.f32 %v204_v25  ;;  %v205_v28 = vmul.f32 0.70710677, %v198_v26  ;;  %v202_v33 = vmul.f32 0.5, %v198_v26 }
 0x158   :  { %452 = verf.f32 %v205_v28 }
 0x160   :  { %v451_v29 = vpop.eup %450 }
 0x161   :  { %v208_v30 = vadd.f32 1.0, %v451_v29 }
 0x162   :  { %v453_v31 = vpop.eup %452 }
 0x163   :  { %v209_v34 = vadd.f32 1.0, %v453_v31  ;;  %v210_v35 = vmul.f32 %v208_v30, %v201_v32 }
 0x165   :  { %v211_v36 = vmul.f32 %v209_v34, %v202_v33 }
 0x167   :  { %v212_v37 = vpack.c.bf16 %v211_v36, %v210_v35 }
 0x169   :  { %419 = vmatmul.mubr.bf16.vlgmr.msra.gmra.mrb[0].mxu1 %v212_v37 }
 0x23c   :  { %v318_v39 = vpop.f32.mrb[0].mxu1 }
 0x23d   :  { %v319_v40 = vadd.f32 %v355_v38, %v318_v39  ;;  %v420_v41 = vpop.f32.mrb[1].mxu1 }
 0x23e   :  { %v321_v42 = vpop.f32.mrb[2].mxu1 }
 0x23f   :  { %325 = vst [vmem:[#allocation11] sm:$0xff] %v319_v40  ;;  %v322_v43 = vadd.f32 %v355_v38, %v321_v42  ;;  %v421_v44 = vpop.f32.mrb[3].mxu1 }
 0x241   :  { %326 = vst [vmem:[#allocation11 + $0x8] sm:$0xff] %v322_v43 }
 0x242   :  { %575 = shalt.err (!%p572_p2)
}
 0x243   :  { %s576_s9 = scalar_lea.hbm %s719_s5, 256 }
 0x244   :  { %p577_p3 = scmp.ne.s32.totalorder %s719_s5, %s576_s9  ;;  %p580_p4 = scmp.lt.u32.totalorder %s576_s9, %s719_s5 }
 0x246   :  { %p582_p5 = pnand %p580_p4, %p577_p3 }
 0x248   :  { %585 = shalt.err (!%p582_p5)
}
 0x249   :  { %338 = dma.vmem_to_hbm [thread:$0]  %s333_s30, 256, %s719_s5, [#allocation4], %s599_s3, %s599_s3, %s600_s28  }
 0x24a   :  { %592 = dma.done.wait [#allocation4], 256  }
 0x24b   :  { %593 = vsyncadd [#allocation4], 4294967040 }
 0x24c   :  { %342 = vsyncpa [#allocation3], 1 }
 0x24d   :  { %343 = vsyncpa [#allocation6], 1 }
 0x24e   :  { %344 = vsyncpa [#allocation9], 1 }
 0x24f   :  { %345 = vsyncpa [#allocation4], 1 }

</bundles_post_ra>
